<compile_context>
chip_gen: v6e
topology: v6e:2x2x1
jax: 0.10.0
libtpu: 0.0.40
codegen_flags: <defaults>
</compile_context>

<pallas_src>
import math

import jax
import jax.numpy as jnp
from jax.experimental import pallas as pl
from jax.experimental.pallas import tpu as pltpu

# --- deterministic "module parameters" ------------------------------------
TR_WEIGHT = 0.3
ROT_WEIGHT = 0.3
TOR_WEIGHT = 0.4   # unused on the no_torsion path (kept for spec parity)
EPS = 1e-5

# NoiseSchedule: sigma(t) = sigma_min**(1-t) * sigma_max**t  (DiffDock defaults)
TR_SIGMA_MIN, TR_SIGMA_MAX = 0.1, 19.0
ROT_SIGMA_MIN, ROT_SIGMA_MAX = 0.03, 1.55

# FMA-shaped affine for the schedule: sigma(t)**k = exp(c0 + t*c1).
# Translation constants are pre-doubled so exp() yields tr_sigma**2 directly.
_C0_TR = 2.0 * math.log(TR_SIGMA_MIN)
_C1_TR = 2.0 * (math.log(TR_SIGMA_MAX) - math.log(TR_SIGMA_MIN))
_C0_ROT = math.log(ROT_SIGMA_MIN)
_C1_ROT = math.log(ROT_SIGMA_MAX) - math.log(ROT_SIGMA_MIN)
_SQRT3 = math.sqrt(3.0)
_INV_SQRT3 = 1.0 / _SQRT3


def _diffusion_loss_kernel(tr_pred_ref, rot_pred_ref, tr_score_ref,
                           rot_score_ref, t_tr_ref, t_rot_ref, out_ref):
    # Inputs: four (B, 3) tensors and two (B, 1) diffusion times.  B sits on
    # the sublane axis, so no wrapper-side transpose/relayout is needed.
    tr_pred = tr_pred_ref[...].astype(jnp.float32)
    rot_pred = rot_pred_ref[...].astype(jnp.float32)
    tr_score = tr_score_ref[...].astype(jnp.float32)
    rot_score = rot_score_ref[...].astype(jnp.float32)
    t_tr = t_tr_ref[...].astype(jnp.float32)      # (B, 1)
    t_rot = t_rot_ref[...].astype(jnp.float32)    # (B, 1)

    b = tr_pred.shape[0]
    inv_cnt = 1.0 / (3.0 * b)                     # static true element count (no padding)

    # --- noise schedule (scalar literals only -> nothing captured) -----------
    tr_s2 = jnp.exp(_C0_TR + t_tr * _C1_TR)       # (B,1) == tr_sigma**2
    rot_s = jnp.exp(_C0_ROT + t_rot * _C1_ROT)    # (B,1) == rot_sigma

    # TODO(synk): so3.score_norm is a precomputed IGSO(3) lookup table in the
    # original code; replaced with its small-sigma analytic limit sqrt(3)/sigma.
    # 1/(sqrt(3)/rot_s + eps) = (rot_s/sqrt3)/(1 + eps*rot_s/sqrt3)
    #                        ~= (rot_s/sqrt3)*(1 - eps*rot_s/sqrt3)   (rel err ~1e-10)
    rot_su = rot_s * _INV_SQRT3                   # rot_s / sqrt(3)
    inv_denom = rot_su * (1.0 - EPS * rot_su)     # (B,1), multiply-only (no divide)

    # ---- per-element loss terms ---------------------------------------------
    d_tr = tr_pred - tr_score
    term_tr = d_tr * d_tr * tr_s2                 # (B,3)
    term_trb = tr_score * tr_score * tr_s2        # (B,3)
    d_rot = (rot_pred - rot_score) * inv_denom
    term_rot = d_rot * d_rot                      # (B,3)
    b_rot = rot_score * rot_su                    # rot_score / score_norm
    term_rotb = b_rot * b_rot                     # (B,3)

    # ---- one combined reduction path -----------------------------------------
    # Per-group lane sums -> pack into (B,4) -> single sublane reduce -> (1,4)
    # means ordered [tr_loss, rot_loss, tr_base_loss, rot_base_loss].
    grouped = jnp.concatenate(
        [jnp.sum(term_tr, axis=1, keepdims=True),
         jnp.sum(term_rot, axis=1, keepdims=True),
         jnp.sum(term_trb, axis=1, keepdims=True),
         jnp.sum(term_rotb, axis=1, keepdims=True)], axis=1)      # (B,4)
    means = jnp.sum(grouped, axis=0, keepdims=True) * inv_cnt     # (1,4)

    # no_torsion=True, apply_mean=True -> torsion term not added.
    loss = means[:, 0:1] * TR_WEIGHT + means[:, 1:2] * ROT_WEIGHT  # (1,1)

    # ---- single vector store: [loss, tr, rot, tr_base, rot_base, 0, 0, 0] ----
    pad = means[:, 0:3] * 0.0                                      # (1,3) staged zeros
    out_ref[...] = jnp.concatenate([loss, means, pad], axis=1)     # (1,8)


def diffusion_loss(tr_pred, rot_pred, tr_score, rot_score, t_tr, t_rot):
    """apply_mean=True / no_torsion=True path of DiffusionLoss.forward."""
    B = tr_pred.shape[0]

    # Contiguous (B,) -> (B,1) is metadata-only; no relayout, no extra fusion.
    t_tr2 = t_tr.reshape(B, 1)
    t_rot2 = t_rot.reshape(B, 1)

    vmem = pl.BlockSpec(memory_space=pltpu.MemorySpace.VMEM)
    bytes_in = sum(int(a.size) * a.dtype.itemsize
                   for a in (tr_pred, rot_pred, tr_score, rot_score, t_tr2, t_rot2))

    out = pl.pallas_call(
        _diffusion_loss_kernel,
        out_shape=jax.ShapeDtypeStruct((1, 8), jnp.float32),
        in_specs=[vmem] * 6,
        out_specs=vmem,
        compiler_params=pltpu.CompilerParams(vmem_limit_bytes=1 << 20),
        cost_estimate=pl.CostEstimate(
            flops=40 * B, transcendentals=2 * B,
            bytes_accessed=bytes_in + 8 * 4),
    )(tr_pred, rot_pred, tr_score, rot_score, t_tr2, t_rot2)

    return {
        "loss": out[0, 0],
        "tr_loss": out[0, 1],
        "rot_loss": out[0, 2],
        "tr_base_loss": out[0, 3],
        "rot_base_loss": out[0, 4],
    }


def _reference(tr_pred, rot_pred, tr_score, rot_score, t_tr, t_rot):
    t_tr = t_tr.reshape(-1, 1)
    t_rot = t_rot.reshape(-1, 1)
    tr_s = jnp.exp((1.0 - t_tr) * math.log(TR_SIGMA_MIN) + t_tr * math.log(TR_SIGMA_MAX))
    rot_s = jnp.exp((1.0 - t_rot) * math.log(ROT_SIGMA_MIN) + t_rot * math.log(ROT_SIGMA_MAX))
    tr_loss = jnp.mean((tr_pred - tr_score) ** 2 * tr_s ** 2)
    tr_base = jnp.mean(tr_score ** 2 * tr_s ** 2)
    rsn = _SQRT3 / rot_s
    rot_loss = jnp.mean(((rot_pred - rot_score) / (rsn + EPS)) ** 2)
    rot_base = jnp.mean((rot_score / rsn) ** 2)
    loss = tr_loss * TR_WEIGHT + rot_loss * ROT_WEIGHT
    return {"loss": loss, "tr_loss": tr_loss, "rot_loss": rot_loss,
            "tr_base_loss": tr_base, "rot_base_loss": rot_base}


if __name__ == "__main__":
    key = jax.random.PRNGKey(0)
    B = 4
    k1, k2, k3, k4, k5, k6 = jax.random.split(key, 6)
    tr_pred = jax.random.normal(k1, (B, 3), jnp.float32)
    rot_pred = jax.random.normal(k2, (B, 3), jnp.float32)
    tr_score = jax.random.normal(k3, (B, 3), jnp.float32)
    rot_score = jax.random.normal(k4, (B, 3), jnp.float32)
    t_tr = jax.random.uniform(k5, (B,), jnp.float32)
    t_rot = jax.random.uniform(k6, (B,), jnp.float32)

    loss_fn = jax.jit(diffusion_loss)
    losses = loss_fn(tr_pred, rot_pred, tr_score, rot_score, t_tr, t_rot)
    jax.block_until_ready(losses)

    ref = _reference(tr_pred, rot_pred, tr_score, rot_score, t_tr, t_rot)
    for k in ref:
        assert jnp.allclose(losses[k], ref[k], rtol=1e-4, atol=1e-4), (
            k, losses[k], ref[k])

    print("KERNEL_OK")
</pallas_src>

<mosaic_0001>
module attributes {stable_mosaic.version = 11 : i64} {
  func.func @_diffusion_loss_kernel(%arg0: memref<4x3xf32, #tpu.memory_space<vmem>>, %arg1: memref<4x3xf32, #tpu.memory_space<vmem>>, %arg2: memref<4x3xf32, #tpu.memory_space<vmem>>, %arg3: memref<4x3xf32, #tpu.memory_space<vmem>>, %arg4: memref<4x1xf32, #tpu.memory_space<vmem>>, %arg5: memref<4x1xf32, #tpu.memory_space<vmem>>, %arg6: memref<1x8xf32, #tpu.memory_space<vmem>>) attributes {dimension_semantics = [], scalar_prefetch = 0 : i64, scratch_operands = 0 : i64, tpu.core_type = #tpu.core_type<tc>} {
    %c0 = arith.constant 0 : index
    %c0_0 = arith.constant 0 : index
    %0 = vector.load %arg0[%c0, %c0_0] : memref<4x3xf32, #tpu.memory_space<vmem>>, vector<4x3xf32>
    %c0_1 = arith.constant 0 : index
    %c0_2 = arith.constant 0 : index
    %1 = vector.load %arg1[%c0_1, %c0_2] : memref<4x3xf32, #tpu.memory_space<vmem>>, vector<4x3xf32>
    %c0_3 = arith.constant 0 : index
    %c0_4 = arith.constant 0 : index
    %2 = vector.load %arg2[%c0_3, %c0_4] : memref<4x3xf32, #tpu.memory_space<vmem>>, vector<4x3xf32>
    %c0_5 = arith.constant 0 : index
    %c0_6 = arith.constant 0 : index
    %3 = vector.load %arg3[%c0_5, %c0_6] : memref<4x3xf32, #tpu.memory_space<vmem>>, vector<4x3xf32>
    %c0_7 = arith.constant 0 : index
    %c0_8 = arith.constant 0 : index
    %4 = vector.load %arg4[%c0_7, %c0_8] : memref<4x1xf32, #tpu.memory_space<vmem>>, vector<4x1xf32>
    %c0_9 = arith.constant 0 : index
    %c0_10 = arith.constant 0 : index
    %5 = vector.load %arg5[%c0_9, %c0_10] : memref<4x1xf32, #tpu.memory_space<vmem>>, vector<4x1xf32>
    %cst = arith.constant 10.4940481 : f32
    %6 = vector.broadcast %cst : f32 to vector<4x1xf32>
    %7 = arith.mulf %4, %6 : vector<4x1xf32>
    %cst_11 = arith.constant -4.60517025 : f32
    %8 = vector.broadcast %cst_11 : f32 to vector<4x1xf32>
    %9 = arith.addf %8, %7 : vector<4x1xf32>
    %10 = math.exp %9 : vector<4x1xf32>
    %cst_12 = arith.constant 3.94481277 : f32
    %11 = vector.broadcast %cst_12 : f32 to vector<4x1xf32>
    %12 = arith.mulf %5, %11 : vector<4x1xf32>
    %cst_13 = arith.constant -3.50655794 : f32
    %13 = vector.broadcast %cst_13 : f32 to vector<4x1xf32>
    %14 = arith.addf %13, %12 : vector<4x1xf32>
    %15 = math.exp %14 : vector<4x1xf32>
    %cst_14 = arith.constant 0.577350259 : f32
    %16 = vector.broadcast %cst_14 : f32 to vector<4x1xf32>
    %17 = arith.mulf %15, %16 : vector<4x1xf32>
    %cst_15 = arith.constant 9.99999974E-6 : f32
    %18 = vector.broadcast %cst_15 : f32 to vector<4x1xf32>
    %19 = arith.mulf %18, %17 : vector<4x1xf32>
    %cst_16 = arith.constant 1.000000e+00 : f32
    %20 = vector.broadcast %cst_16 : f32 to vector<4x1xf32>
    %21 = arith.subf %20, %19 : vector<4x1xf32>
    %22 = arith.mulf %17, %21 : vector<4x1xf32>
    %23 = arith.subf %0, %2 : vector<4x3xf32>
    %24 = arith.mulf %23, %23 : vector<4x3xf32>
    %25 = vector.broadcast %10 : vector<4x1xf32> to vector<4x3xf32>
    %26 = arith.mulf %24, %25 : vector<4x3xf32>
    %27 = arith.mulf %2, %2 : vector<4x3xf32>
    %28 = vector.broadcast %10 : vector<4x1xf32> to vector<4x3xf32>
    %29 = arith.mulf %27, %28 : vector<4x3xf32>
    %30 = arith.subf %1, %3 : vector<4x3xf32>
    %31 = vector.broadcast %22 : vector<4x1xf32> to vector<4x3xf32>
    %32 = arith.mulf %30, %31 : vector<4x3xf32>
    %33 = arith.mulf %32, %32 : vector<4x3xf32>
    %34 = vector.broadcast %17 : vector<4x1xf32> to vector<4x3xf32>
    %35 = arith.mulf %3, %34 : vector<4x3xf32>
    %36 = arith.mulf %35, %35 : vector<4x3xf32>
    %cst_17 = arith.constant dense<0.000000e+00> : vector<4xf32>
    %37 = vector.multi_reduction <add>, %26, %cst_17 [1] : vector<4x3xf32> to vector<4xf32>
    %38 = vector.shape_cast %37 : vector<4xf32> to vector<4x1xf32>
    %cst_18 = arith.constant dense<0.000000e+00> : vector<4xf32>
    %39 = vector.multi_reduction <add>, %33, %cst_18 [1] : vector<4x3xf32> to vector<4xf32>
    %40 = vector.shape_cast %39 : vector<4xf32> to vector<4x1xf32>
    %cst_19 = arith.constant dense<0.000000e+00> : vector<4xf32>
    %41 = vector.multi_reduction <add>, %29, %cst_19 [1] : vector<4x3xf32> to vector<4xf32>
    %42 = vector.shape_cast %41 : vector<4xf32> to vector<4x1xf32>
    %cst_20 = arith.constant dense<0.000000e+00> : vector<4xf32>
    %43 = vector.multi_reduction <add>, %36, %cst_20 [1] : vector<4x3xf32> to vector<4xf32>
    %44 = vector.shape_cast %43 : vector<4xf32> to vector<4x1xf32>
    %45 = tpu.concatenate %38, %40, %42, %44 in 1 : vector<4x1xf32>, vector<4x1xf32>, vector<4x1xf32>, vector<4x1xf32> -> vector<4x4xf32>
    %cst_21 = arith.constant dense<0.000000e+00> : vector<4xf32>
    %46 = vector.multi_reduction <add>, %45, %cst_21 [0] : vector<4x4xf32> to vector<4xf32>
    %47 = vector.shape_cast %46 : vector<4xf32> to vector<1x4xf32>
    %cst_22 = arith.constant 0.0833333358 : f32
    %48 = vector.broadcast %cst_22 : f32 to vector<1x4xf32>
    %49 = arith.mulf %47, %48 : vector<1x4xf32>
    %50 = vector.extract_strided_slice %49 {offsets = [0, 0], sizes = [1, 1], strides = [1, 1]} : vector<1x4xf32> to vector<1x1xf32>
    %cst_23 = arith.constant 3.000000e-01 : f32
    %51 = vector.broadcast %cst_23 : f32 to vector<1x1xf32>
    %52 = arith.mulf %50, %51 : vector<1x1xf32>
    %53 = vector.extract_strided_slice %49 {offsets = [0, 1], sizes = [1, 1], strides = [1, 1]} : vector<1x4xf32> to vector<1x1xf32>
    %cst_24 = arith.constant 3.000000e-01 : f32
    %54 = vector.broadcast %cst_24 : f32 to vector<1x1xf32>
    %55 = arith.mulf %53, %54 : vector<1x1xf32>
    %56 = arith.addf %52, %55 : vector<1x1xf32>
    %57 = vector.extract_strided_slice %49 {offsets = [0, 0], sizes = [1, 3], strides = [1, 1]} : vector<1x4xf32> to vector<1x3xf32>
    %cst_25 = arith.constant 0.000000e+00 : f32
    %58 = vector.broadcast %cst_25 : f32 to vector<1x3xf32>
    %59 = arith.mulf %57, %58 : vector<1x3xf32>
    %60 = tpu.concatenate %56, %49, %59 in 1 : vector<1x1xf32>, vector<1x4xf32>, vector<1x3xf32> -> vector<1x8xf32>
    %c0_26 = arith.constant 0 : index
    %c0_27 = arith.constant 0 : index
    %61 = vector.load %arg6[%c0_26, %c0_27] : memref<1x8xf32, #tpu.memory_space<vmem>>, vector<1x8xf32>
    tpu.vector_store %arg6[%c0_26, %c0_27], %60 {strides = array<i32>} : memref<1x8xf32, #tpu.memory_space<vmem>>, vector<1x8xf32>,
    return
  }
}

</mosaic_0001>

<bundles_post_ra>
// kernel: diffusion_loss.1
= control target key start
LH: loop header
LB: loop body
LE: loop exit
PB: predicated region body
PF: predicated region fallthrough
CT: control target
= control target key end

     0   :  { %v128_v0 = vmov 0   ;;  %vm66_vm0 = vcmask 19456   ;;  %vm79_vm1 = vcmask 7168   ;;  %vm81_vm2 = vcmask 15360   ;;  %s190_s5 = inlined_call_operand.vmem [shape: f32[4,1], index: 5, kind: input, shape index: {}]   ;;  %s191_s4 = inlined_call_operand.vmem [shape: f32[4,1], index: 4, kind: input, shape index: {}]   ;;  %s192_s1 = inlined_call_operand.vmem [shape: f32[4,3], index: 1, kind: input, shape index: {}]   ;;  %s193_s3 = inlined_call_operand.vmem [shape: f32[4,3], index: 3, kind: input, shape index: {}]   ;;  %s194_s0 = inlined_call_operand.vmem [shape: f32[4,3], index: 0, kind: input, shape index: {}]   ;;  %s195_s2 = inlined_call_operand.vmem [shape: f32[4,3], index: 2, kind: input, shape index: {}]   ;;  %s196_s6 = inlined_call_operand.vmem [shape: f32[1,8], index: 6, kind: output, shape index: {}]  }
   0x1   :  { %122 = vset.pattern.permute.xlu0 %v128_v0  ;;  %v28_v1 = vld [vmem:[%s190_s5] sm:$0xf]  ;;  %123 = vset.pattern.permute.xlu1 %v128_v0  ;;  %vm83_vm3 = vcmask 23552   ;;  %vm85_vm4 = vcmask 27648   ;;  %vm110_vm5 = vcmask 39936   ;;  %vm112_vm6 = vcmask 57344  }
   0x2   :  { %v33_v2 = vmul.f32 3.9448128, %v28_v1  ;;  %v27_v3 = vld [vmem:[%s191_s4] sm:$0xf] }
   0x3   :  { %v29_v6 = vmul.f32 10.494048, %v27_v3  ;;  %v24_v15 = vld [vmem:[%s192_s1] sm:$0xf]  ;;  %s130_s1 = smov 127  }
   0x4   :  { %v34_v4 = vadd.f32 -3.506558, %v33_v2  ;;  %v26_v16 = vld [vmem:[%s193_s3] sm:$0xf] }
   0x5   :  { %v30_v7 = vadd.f32 -4.6051702, %v29_v6  ;;  %v23_v17 = vld [vmem:[%s194_s0] sm:$0xf]  ;;  %v51_v19 = vsub.f32 %v24_v15, %v26_v16  ;;  %s129_s0 = smov 1  }
   0x6   :  { %v35_v5 = vmul.f32 1.442695, %v34_v4  ;;  %v25_v18 = vld [vmem:[%s195_s2] sm:$0xf]  ;;  %s131_s2 = smov 5  }
   0x7   :  { %v31_v8 = vmul.f32 1.442695, %v30_v7  ;;  %v41_v20 = vsub.f32 %v23_v17, %v25_v18  ;;  %v49_v25 = vmul.f32 %v25_v18, %v25_v18 }
   0x8   :  { %124 = vpow2.f32 %v35_v5 }
   0x9   :  { %126 = vpow2.f32 %v31_v8  ;;  %v42_v24 = vmul.f32 %v41_v20, %v41_v20 }
  0x15   :  { %v125_v9 = vpop.eup %124 }
  0x16   :  { %v37_v10 = vmul.f32 0.57735026, %v125_v9  ;;  %v127_v14 = vpop.eup %126 }
  0x18   :  { %v38_v11 = vmul.f32 1e-05, %v37_v10  ;;  %61 = vperm.xlu1 %123, %v37_v10  }
  0x1a   :  { %v39_v12 = vsub.f32 1.0, %v38_v11 }
  0x1c   :  { %v40_v13 = vmul.f32 %v39_v12, %v37_v10 }
  0x1e   :  { %54 = vperm.xlu0 %122, %v40_v13  }
  0x22   :  { %45 = vperm.xlu0 %122, %v127_v14  }
  0x93   :  { %v62_v21 = vpop.permute.xlu1 %61 }
  0x94   :  { %v64_v26 = vmul.f32 %v62_v21, %v26_v16 }
  0x96   :  { %v65_v31 = vmul.f32 %v64_v26, %v64_v26 }
  0x98   :  { %v76_v35 = vsel %vm66_vm0, %v65_v31, 0.0 }
  0x99   :  { %v55_v22 = vpop.permute.xlu0 %54 }
  0x9a   :  { %v57_v23 = vmul.f32 %v55_v22, %v51_v19 }
  0x9c   :  { %v58_v27 = vmul.f32 %v57_v23, %v57_v23 }
  0x9d   :  { %v46_v28 = vpop.permute.xlu0 %45 }
  0x9e   :  { %v48_v29 = vmul.f32 %v46_v28, %v42_v24  ;;  %v50_v30 = vmul.f32 %v49_v25, %v46_v28  ;;  %v70_v32 = vsel %vm66_vm0, %v58_v27, 0.0 }
  0x9f   :  { %71 = vadd.xlane.f32.xlu0 %v70_v32 }
  0xa0   :  { %v67_v33 = vsel %vm66_vm0, %v48_v29, 0.0  ;;  %v73_v34 = vsel %vm66_vm0, %v50_v30, 0.0 }
  0xa1   :  { %68 = vadd.xlane.f32.xlu1 %v67_v33 }
  0xa3   :  { %74 = vadd.xlane.f32.xlu0 %v73_v34 }
  0xa5   :  { %77 = vadd.xlane.f32.xlu1 %v76_v35 }
 0x128   :  { %v72_v36 = vpop.xlane.xlu0 %71 }
 0x12a   :  { %v69_v37 = vpop.xlane.xlu1 %68 }
 0x12b   :  { %v80_v38 = vsel %vm79_vm1, %v69_v37, %v72_v36 }
 0x12c   :  { %v75_v39 = vpop.xlane.xlu0 %74 }
 0x12d   :  { %v82_v40 = vsel %vm81_vm2, %v80_v38, %v75_v39 }
 0x12e   :  { %v78_v41 = vpop.xlane.xlu1 %77 }
 0x12f   :  { %v84_v42 = vsel %vm83_vm3, %v82_v40, %v78_v41 }
 0x130   :  { %v86_v43 = vsel %vm85_vm4, %v84_v42, 0.0 }
 0x131   :  { %v87_v44 = vrot.slane %v86_v43, 4 }
 0x133   :  { %v88_v45 = vadd.f32 %v87_v44, %v86_v43 }
 0x135   :  { %v89_v46 = vrot.slane %v88_v45, 2 }
 0x137   :  { %v90_v47 = vadd.f32 %v89_v46, %v88_v45 }
 0x139   :  { %v91_v48 = vrot.slane %v90_v47, 1 }
 0x13b   :  { %v92_v49 = vadd.f32 %v91_v48, %v90_v47 }
 0x13d   :  { %v93_v50 = vmul.f32 0.083333336, %v92_v49 }
 0x13f   :  { %102 = vrot.lane.b32.xlu1 %v93_v50, %s129_s0  ;;  %v94_v51 = vmul.f32 0.3, %v93_v50  ;;  %v100_v52 = vmul.f32 0.0, %v93_v50 }
 0x141   :  { %96 = vrot.lane.b32.xlu0 %v94_v51, %s130_s1 }
 0x143   :  { %106 = vrot.lane.b32.xlu1 %v100_v52, %s131_s2 }
 0x1b1   :  { %v103_v53 = vpop.permute.xlu1 %102 }
 0x1b3   :  { %v97_v54 = vpop.permute.xlu0 %96 }
 0x1b4   :  { %v99_v55 = vadd.f32 %v97_v54, %v94_v51 }
 0x1b5   :  { %v107_v56 = vpop.permute.xlu1 %106 }
 0x1b6   :  { %v109_v57 = vsel %vm79_vm1, %v99_v55, %v103_v53 }
 0x1b7   :  { %v111_v58 = vsel %vm110_vm5, %v109_v57, %v107_v56 }
 0x1b8   :  { %113 = vst.msk [vmem:[%s196_s6] sm:$0x1] %vm112_vm6, %v111_v58 }

</bundles_post_ra>
